<compile_context>
chip_gen: v5e
topology: v5e:2x2
jax: 0.10.0
libtpu: 0.0.40
codegen_flags: <defaults>
</compile_context>

<pallas_src>
import math

import jax
import jax.numpy as jnp
from jax.experimental import pallas as pl
from jax.experimental.pallas import tpu as pltpu


def _make_mha_kernel(block_b, seq_len, head_num, head_dim, d_in, compute_dtype):
    R = block_b * seq_len          # rows per grid step (MXU M dimension)

    def kernel(q_ref, k_ref, v_ref, pos_ref,
               wq_ref, bq_ref, wk_ref, bk_ref, wv_ref, bv_ref,
               wo_ref, bo_ref, out_ref):
        cd = compute_dtype
        pos = pos_ref[...]                                    # (R, D_in) f32
        # Positional add in f32; only the matmul operands are cast to `cd`.
        xq = (q_ref[...] + pos).astype(cd)
        xk = (k_ref[...] + pos).astype(cd)
        xv = (v_ref[...] + pos).astype(cd)

        # Fused projections: one lane-dense (R, D_in) @ (D_in, H*D) matmul
        # each.  1/sqrt(D) is already folded into wq/bq.  f32 accumulation.
        q = jnp.dot(xq, wq_ref[...], preferred_element_type=jnp.float32) + bq_ref[...]
        k = jnp.dot(xk, wk_ref[...], preferred_element_type=jnp.float32) + bk_ref[...]
        v = jnp.dot(xv, wv_ref[...], preferred_element_type=jnp.float32) + bv_ref[...]

        # Per-head attention (static unroll; head slices are static lane slices).
        ctx_heads = []
        for h in range(head_num):
            sl = slice(h * head_dim, (h + 1) * head_dim)
            qh = q[:, sl].reshape(block_b, seq_len, head_dim).astype(cd)
            kh = k[:, sl].reshape(block_b, seq_len, head_dim).astype(cd)
            vh = v[:, sl].reshape(block_b, seq_len, head_dim).astype(cd)

            # Contraction over the last axis of both operands -> no
            # materialized transpose of kh.
            scores = jnp.einsum("bqd,bkd->bqk", qh, kh,
                                preferred_element_type=jnp.float32)   # (Bt,S,S)

            # Numerically stable softmax; exact normalization in f32.
            m = jnp.max(scores, axis=-1, keepdims=True)
            e = jnp.exp(scores - m)
            attn = e / jnp.sum(e, axis=-1, keepdims=True)
            # TODO(synk): attention dropout omitted (inference / eval mode).

            ctx = jnp.einsum("bqk,bkd->bqd", attn.astype(cd), vh,
                             preferred_element_type=jnp.float32)      # (Bt,S,D)
            ctx_heads.append(ctx.reshape(R, head_dim))

        # Head concat along lanes -> single lane-dense output projection.
        ctx_all = jnp.concatenate(ctx_heads, axis=-1).astype(cd)      # (R, H*D)
        out = jnp.dot(ctx_all, wo_ref[...],
                      preferred_element_type=jnp.float32) + bo_ref[...]
        out_ref[...] = out.astype(out_ref.dtype)

    return kernel


def _pick_block_b(B, S, target_rows=2048, min_grid_steps=2):
    """Largest divisor Bt of B with Bt*S <= target_rows, an 8-row-aligned tile,
    and at least `min_grid_steps` grid steps (keeps both v7x TCs busy)."""
    best = B   # fallback: whole array in one step (always layout-legal)
    for bt in range(1, B + 1):
        if B % bt:
            continue
        R = bt * S
        if bt != B and R % 8 != 0:
            continue                      # keep the (8,128) block rule happy
        if R > target_rows:
            continue
        if (B // bt) < min(min_grid_steps, B):
            continue
        best = bt
    return best


def multi_head_attention(query, key, value, pos, params, head_num,
                         compute_dtype=jnp.bfloat16, block_b=None):
    """query/key/value/pos: (B, S, D_in) float32.  Returns (B, S, D_in)."""
    B, S, D_in = query.shape
    D = D_in                              # hidden_dim == input_dim in the module
    H = head_num
    HD = H * D
    scale = 1.0 / math.sqrt(float(D))

    # ---- host-side parameter prep ----
    # Fold the softmax scale into the Q projection; keep fused (D_in, H*D) /
    # (H*D, D_in) weight layouts so every matmul is 128-lane dense.  Biases
    # stay f32 and are added after the f32-accumulated matmuls.
    wq = (params["wq"] * scale).astype(compute_dtype)   # (D_in, H*D)
    wk = params["wk"].astype(compute_dtype)
    wv = params["wv"].astype(compute_dtype)
    wo = params["wo"].astype(compute_dtype)             # (H*D, D_in)
    bq = params["bq"] * scale                           # (1, H*D) f32
    bk = params["bk"]
    bv = params["bv"]
    bo = params["bo"]                                   # (1, D_in) f32

    if block_b is None:
        block_b = _pick_block_b(B, S)
    R = block_b * S

    # Flatten batch*seq into the matmul row dimension (rows stay f32: the
    # positional add happens in f32 in-kernel; only matmul operands are cast).
    q2 = query.reshape(B * S, D_in)
    k2 = key.reshape(B * S, D_in)
    v2 = value.reshape(B * S, D_in)
    p2 = pos.reshape(B * S, D_in)

    kernel = _make_mha_kernel(block_b, S, H, D, D_in, compute_dtype)

    row_spec = pl.BlockSpec((R, D_in), lambda i: (i, 0))
    const = lambda shape: pl.BlockSpec(shape, lambda i: (0,) * len(shape))

    out2 = pl.pallas_call(
        kernel,
        out_shape=jax.ShapeDtypeStruct((B * S, D_in), query.dtype),
        grid=(B // block_b,),
        in_specs=[
            row_spec, row_spec, row_spec, row_spec,   # q, k, v, pos rows
            const((D_in, HD)), const((1, HD)),        # wq, bq
            const((D_in, HD)), const((1, HD)),        # wk, bk
            const((D_in, HD)), const((1, HD)),        # wv, bv
            const((HD, D_in)), const((1, D_in)),      # wo, bo
        ],
        out_specs=row_spec,
        compiler_params=pltpu.CompilerParams(
            dimension_semantics=("parallel",),        # batch tiles -> megacore/TC split
            vmem_limit_bytes=48 * 1024 * 1024),       # <= v7x 64 MiB, > 32 MiB default
    )(q2, k2, v2, p2, wq, bq, wk, bk, wv, bv, wo, bo)

    return out2.reshape(B, S, D_in)


def _reference(query, key, value, pos, params, head_num):
    """Plain-JAX reference mirroring the PyTorch forward (eval mode, mask=None)."""
    B, S, D_in = query.shape
    D = D_in
    HD = head_num * D
    q = (query + pos) @ params["wq"] + params["bq"]
    k = (key + pos) @ params["wk"] + params["bk"]
    v = (value + pos) @ params["wv"] + params["bv"]
    def split(x):
        return x.reshape(B, S, head_num, D).transpose(0, 2, 1, 3)   # (B,H,S,D)
    q, k, v = split(q), split(k), split(v)
    scores = jnp.einsum("bhqd,bhkd->bhqk", q, k) / math.sqrt(D)
    attn = jax.nn.softmax(scores, axis=-1)
    ctx = jnp.einsum("bhqk,bhkd->bhqd", attn, v)
    ctx = ctx.transpose(0, 2, 1, 3).reshape(B, S, HD)
    return ctx @ params["wo"] + params["bo"]


def init_params(key, d_in, head_num):
    """Deterministic PyTorch-Linear-style init; weights stored pre-transposed."""
    D = d_in
    HD = head_num * D
    keys = jax.random.split(key, 8)
    def lin(kw, kb, fan_in, fan_out):
        bound = 1.0 / math.sqrt(fan_in)
        w = jax.random.uniform(kw, (fan_in, fan_out), jnp.float32, -bound, bound)
        b = jax.random.uniform(kb, (1, fan_out), jnp.float32, -bound, bound)
        return w, b
    wq, bq = lin(keys[0], keys[1], d_in, HD)
    wk, bk = lin(keys[2], keys[3], d_in, HD)
    wv, bv = lin(keys[4], keys[5], d_in, HD)
    wo, bo = lin(keys[6], keys[7], HD, d_in)
    return dict(wq=wq, bq=bq, wk=wk, bk=bk, wv=wv, bv=bv, wo=wo, bo=bo)


if __name__ == "__main__":
    B, S, D_IN, HEAD_NUM = 2, 8, 32, 4

    root = jax.random.PRNGKey(0)
    k_q, k_k, k_v, k_p, k_params = jax.random.split(root, 5)
    query = jax.random.normal(k_q, (B, S, D_IN), jnp.float32)
    key_t = jax.random.normal(k_k, (B, S, D_IN), jnp.float32)
    value = jax.random.normal(k_v, (B, S, D_IN), jnp.float32)
    pos = jax.random.normal(k_p, (B, S, D_IN), jnp.float32)

    params = init_params(k_params, D_IN, HEAD_NUM)
    ref = _reference(query, key_t, value, pos, params, HEAD_NUM)

    # f32 compute path: tight check against the reference.
    out = multi_head_attention(query, key_t, value, pos, params, HEAD_NUM,
                               compute_dtype=jnp.float32)
    out = jax.block_until_ready(out)
    assert out.shape == (B, S, D_IN)
    assert jnp.allclose(out, ref, atol=1e-3, rtol=1e-3), "f32 mismatch vs reference"

    # Default path (bf16 matmul operands, f32 accumulation/softmax): looser
    # tolerance accounts only for bf16 rounding of inputs/weights/attn.
    out_bf16 = multi_head_attention(query, key_t, value, pos, params, HEAD_NUM)
    out_bf16 = jax.block_until_ready(out_bf16)
    assert out_bf16.shape == (B, S, D_IN)
    assert jnp.allclose(out_bf16, ref, atol=1.5e-1, rtol=5e-2), "bf16 mismatch vs reference"

    print("KERNEL_OK")
</pallas_src>

<mosaic_0001>
module attributes {stable_mosaic.version = 11 : i64} {
  func.func @kernel(%arg0: i32, %arg1: memref<8x32xf32, #tpu.memory_space<vmem>>, %arg2: memref<8x32xf32, #tpu.memory_space<vmem>>, %arg3: memref<8x32xf32, #tpu.memory_space<vmem>>, %arg4: memref<8x32xf32, #tpu.memory_space<vmem>>, %arg5: memref<32x128xf32, #tpu.memory_space<vmem>>, %arg6: memref<1x128xf32, #tpu.memory_space<vmem>>, %arg7: memref<32x128xf32, #tpu.memory_space<vmem>>, %arg8: memref<1x128xf32, #tpu.memory_space<vmem>>, %arg9: memref<32x128xf32, #tpu.memory_space<vmem>>, %arg10: memref<1x128xf32, #tpu.memory_space<vmem>>, %arg11: memref<128x32xf32, #tpu.memory_space<vmem>>, %arg12: memref<1x32xf32, #tpu.memory_space<vmem>>, %arg13: memref<8x32xf32, #tpu.memory_space<vmem>>) attributes {dimension_semantics = [#tpu.dimension_semantics<parallel>], iteration_bounds = array<i64: 2>, scalar_prefetch = 0 : i64, scratch_operands = 0 : i64, tpu.core_type = #tpu.core_type<tc>, window_params = [{transform_indices = @transform_0, window_bounds = array<i64: 8, 32>}, {transform_indices = @transform_1, window_bounds = array<i64: 8, 32>}, {transform_indices = @transform_2, window_bounds = array<i64: 8, 32>}, {transform_indices = @transform_3, window_bounds = array<i64: 8, 32>}, {pipeline_mode = #tpu.pipeline_mode<synchronous>, transform_indices = @transform_4, window_bounds = array<i64: 32, 128>}, {pipeline_mode = #tpu.pipeline_mode<synchronous>, transform_indices = @transform_5, window_bounds = array<i64: 1, 128>}, {pipeline_mode = #tpu.pipeline_mode<synchronous>, transform_indices = @transform_6, window_bounds = array<i64: 32, 128>}, {pipeline_mode = #tpu.pipeline_mode<synchronous>, transform_indices = @transform_7, window_bounds = array<i64: 1, 128>}, {pipeline_mode = #tpu.pipeline_mode<synchronous>, transform_indices = @transform_8, window_bounds = array<i64: 32, 128>}, {pipeline_mode = #tpu.pipeline_mode<synchronous>, transform_indices = @transform_9, window_bounds = array<i64: 1, 128>}, {pipeline_mode = #tpu.pipeline_mode<synchronous>, transform_indices = @transform_10, window_bounds = array<i64: 128, 32>}, {pipeline_mode = #tpu.pipeline_mode<synchronous>, transform_indices = @transform_11, window_bounds = array<i64: 1, 32>}, {transform_indices = @transform_12, window_bounds = array<i64: 8, 32>}]} {
    %c0 = arith.constant 0 : index
    %c0_0 = arith.constant 0 : index
    %0 = vector.load %arg4[%c0, %c0_0] : memref<8x32xf32, #tpu.memory_space<vmem>>, vector<8x32xf32>
    %c0_1 = arith.constant 0 : index
    %c0_2 = arith.constant 0 : index
    %1 = vector.load %arg1[%c0_1, %c0_2] : memref<8x32xf32, #tpu.memory_space<vmem>>, vector<8x32xf32>
    %2 = arith.addf %1, %0 : vector<8x32xf32>
    %c0_3 = arith.constant 0 : index
    %c0_4 = arith.constant 0 : index
    %3 = vector.load %arg2[%c0_3, %c0_4] : memref<8x32xf32, #tpu.memory_space<vmem>>, vector<8x32xf32>
    %4 = arith.addf %3, %0 : vector<8x32xf32>
    %c0_5 = arith.constant 0 : index
    %c0_6 = arith.constant 0 : index
    %5 = vector.load %arg3[%c0_5, %c0_6] : memref<8x32xf32, #tpu.memory_space<vmem>>, vector<8x32xf32>
    %6 = arith.addf %5, %0 : vector<8x32xf32>
    %c0_7 = arith.constant 0 : index
    %c0_8 = arith.constant 0 : index
    %7 = vector.load %arg5[%c0_7, %c0_8] : memref<32x128xf32, #tpu.memory_space<vmem>>, vector<32x128xf32>
    %cst = arith.constant dense<0.000000e+00> : vector<8x128xf32>
    %8 = tpu.matmul %2, %7, %cst {dimension_numbers = #tpu.dot_dimension_numbers<[1], [0], [0], [1], [0, 0, 1, 1], [], []>} : vector<8x32xf32>, vector<32x128xf32>, vector<8x128xf32> -> vector<8x128xf32>
    %c0_9 = arith.constant 0 : index
    %c0_10 = arith.constant 0 : index
    %9 = vector.load %arg6[%c0_9, %c0_10] : memref<1x128xf32, #tpu.memory_space<vmem>>, vector<1x128xf32>
    %10 = vector.broadcast %9 : vector<1x128xf32> to vector<8x128xf32>
    %11 = arith.addf %8, %10 : vector<8x128xf32>
    %c0_11 = arith.constant 0 : index
    %c0_12 = arith.constant 0 : index
    %12 = vector.load %arg7[%c0_11, %c0_12] : memref<32x128xf32, #tpu.memory_space<vmem>>, vector<32x128xf32>
    %cst_13 = arith.constant dense<0.000000e+00> : vector<8x128xf32>
    %13 = tpu.matmul %4, %12, %cst_13 {dimension_numbers = #tpu.dot_dimension_numbers<[1], [0], [0], [1], [0, 0, 1, 1], [], []>} : vector<8x32xf32>, vector<32x128xf32>, vector<8x128xf32> -> vector<8x128xf32>
    %c0_14 = arith.constant 0 : index
    %c0_15 = arith.constant 0 : index
    %14 = vector.load %arg8[%c0_14, %c0_15] : memref<1x128xf32, #tpu.memory_space<vmem>>, vector<1x128xf32>
    %15 = vector.broadcast %14 : vector<1x128xf32> to vector<8x128xf32>
    %16 = arith.addf %13, %15 : vector<8x128xf32>
    %c0_16 = arith.constant 0 : index
    %c0_17 = arith.constant 0 : index
    %17 = vector.load %arg9[%c0_16, %c0_17] : memref<32x128xf32, #tpu.memory_space<vmem>>, vector<32x128xf32>
    %cst_18 = arith.constant dense<0.000000e+00> : vector<8x128xf32>
    %18 = tpu.matmul %6, %17, %cst_18 {dimension_numbers = #tpu.dot_dimension_numbers<[1], [0], [0], [1], [0, 0, 1, 1], [], []>} : vector<8x32xf32>, vector<32x128xf32>, vector<8x128xf32> -> vector<8x128xf32>
    %c0_19 = arith.constant 0 : index
    %c0_20 = arith.constant 0 : index
    %19 = vector.load %arg10[%c0_19, %c0_20] : memref<1x128xf32, #tpu.memory_space<vmem>>, vector<1x128xf32>
    %20 = vector.broadcast %19 : vector<1x128xf32> to vector<8x128xf32>
    %21 = arith.addf %18, %20 : vector<8x128xf32>
    %22 = vector.extract_strided_slice %11 {offsets = [0, 0], sizes = [8, 32], strides = [1, 1]} : vector<8x128xf32> to vector<8x32xf32>
    %23 = vector.shape_cast %22 : vector<8x32xf32> to vector<1x8x32xf32>
    %24 = vector.extract_strided_slice %16 {offsets = [0, 0], sizes = [8, 32], strides = [1, 1]} : vector<8x128xf32> to vector<8x32xf32>
    %25 = vector.shape_cast %24 : vector<8x32xf32> to vector<1x8x32xf32>
    %26 = vector.extract_strided_slice %21 {offsets = [0, 0], sizes = [8, 32], strides = [1, 1]} : vector<8x128xf32> to vector<8x32xf32>
    %27 = vector.shape_cast %26 : vector<8x32xf32> to vector<1x8x32xf32>
    "tpu.trace_start"() <{level = 10 : i32, message = "bqd,bkd->bqk"}> : () -> ()
    %cst_21 = arith.constant dense<0.000000e+00> : vector<1x8x8xf32>
    %28 = tpu.matmul %23, %25, %cst_21 {dimension_numbers = #tpu.dot_dimension_numbers<[2], [2], [1], [1], [0, 0, 0, 1, 1, 1], [0], [0]>} : vector<1x8x32xf32>, vector<1x8x32xf32>, vector<1x8x8xf32> -> vector<1x8x8xf32>
    "tpu.trace_stop"() : () -> ()
    %cst_22 = arith.constant dense<0xFF800000> : vector<1x8xf32>
    %29 = vector.multi_reduction <maximumf>, %28, %cst_22 [2] : vector<1x8x8xf32> to vector<1x8xf32>
    %30 = vector.shape_cast %29 : vector<1x8xf32> to vector<1x8x1xf32>
    %31 = vector.broadcast %30 : vector<1x8x1xf32> to vector<1x8x8xf32>
    %32 = arith.subf %28, %31 : vector<1x8x8xf32>
    %33 = math.exp %32 : vector<1x8x8xf32>
    %cst_23 = arith.constant dense<0.000000e+00> : vector<1x8xf32>
    %34 = vector.multi_reduction <add>, %33, %cst_23 [2] : vector<1x8x8xf32> to vector<1x8xf32>
    %35 = vector.shape_cast %34 : vector<1x8xf32> to vector<1x8x1xf32>
    %36 = vector.broadcast %35 : vector<1x8x1xf32> to vector<1x8x8xf32>
    %37 = arith.divf %33, %36 : vector<1x8x8xf32>
    "tpu.trace_start"() <{level = 10 : i32, message = "bqk,bkd->bqd"}> : () -> ()
    %cst_24 = arith.constant dense<0.000000e+00> : vector<1x8x32xf32>
    %38 = tpu.matmul %37, %27, %cst_24 {dimension_numbers = #tpu.dot_dimension_numbers<[2], [1], [1], [2], [0, 0, 0, 1, 1, 2], [0], [0]>} : vector<1x8x8xf32>, vector<1x8x32xf32>, vector<1x8x32xf32> -> vector<1x8x32xf32>
    "tpu.trace_stop"() : () -> ()
    %39 = vector.shape_cast %38 : vector<1x8x32xf32> to vector<8x32xf32>
    %40 = vector.extract_strided_slice %11 {offsets = [0, 32], sizes = [8, 32], strides = [1, 1]} : vector<8x128xf32> to vector<8x32xf32>
    %41 = vector.shape_cast %40 : vector<8x32xf32> to vector<1x8x32xf32>
    %42 = vector.extract_strided_slice %16 {offsets = [0, 32], sizes = [8, 32], strides = [1, 1]} : vector<8x128xf32> to vector<8x32xf32>
    %43 = vector.shape_cast %42 : vector<8x32xf32> to vector<1x8x32xf32>
    %44 = vector.extract_strided_slice %21 {offsets = [0, 32], sizes = [8, 32], strides = [1, 1]} : vector<8x128xf32> to vector<8x32xf32>
    %45 = vector.shape_cast %44 : vector<8x32xf32> to vector<1x8x32xf32>
    "tpu.trace_start"() <{level = 10 : i32, message = "bqd,bkd->bqk"}> : () -> ()
    %cst_25 = arith.constant dense<0.000000e+00> : vector<1x8x8xf32>
    %46 = tpu.matmul %41, %43, %cst_25 {dimension_numbers = #tpu.dot_dimension_numbers<[2], [2], [1], [1], [0, 0, 0, 1, 1, 1], [0], [0]>} : vector<1x8x32xf32>, vector<1x8x32xf32>, vector<1x8x8xf32> -> vector<1x8x8xf32>
    "tpu.trace_stop"() : () -> ()
    %cst_26 = arith.constant dense<0xFF800000> : vector<1x8xf32>
    %47 = vector.multi_reduction <maximumf>, %46, %cst_26 [2] : vector<1x8x8xf32> to vector<1x8xf32>
    %48 = vector.shape_cast %47 : vector<1x8xf32> to vector<1x8x1xf32>
    %49 = vector.broadcast %48 : vector<1x8x1xf32> to vector<1x8x8xf32>
    %50 = arith.subf %46, %49 : vector<1x8x8xf32>
    %51 = math.exp %50 : vector<1x8x8xf32>
    %cst_27 = arith.constant dense<0.000000e+00> : vector<1x8xf32>
    %52 = vector.multi_reduction <add>, %51, %cst_27 [2] : vector<1x8x8xf32> to vector<1x8xf32>
    %53 = vector.shape_cast %52 : vector<1x8xf32> to vector<1x8x1xf32>
    %54 = vector.broadcast %53 : vector<1x8x1xf32> to vector<1x8x8xf32>
    %55 = arith.divf %51, %54 : vector<1x8x8xf32>
    "tpu.trace_start"() <{level = 10 : i32, message = "bqk,bkd->bqd"}> : () -> ()
    %cst_28 = arith.constant dense<0.000000e+00> : vector<1x8x32xf32>
    %56 = tpu.matmul %55, %45, %cst_28 {dimension_numbers = #tpu.dot_dimension_numbers<[2], [1], [1], [2], [0, 0, 0, 1, 1, 2], [0], [0]>} : vector<1x8x8xf32>, vector<1x8x32xf32>, vector<1x8x32xf32> -> vector<1x8x32xf32>
    "tpu.trace_stop"() : () -> ()
    %57 = vector.shape_cast %56 : vector<1x8x32xf32> to vector<8x32xf32>
    %58 = vector.extract_strided_slice %11 {offsets = [0, 64], sizes = [8, 32], strides = [1, 1]} : vector<8x128xf32> to vector<8x32xf32>
    %59 = vector.shape_cast %58 : vector<8x32xf32> to vector<1x8x32xf32>
    %60 = vector.extract_strided_slice %16 {offsets = [0, 64], sizes = [8, 32], strides = [1, 1]} : vector<8x128xf32> to vector<8x32xf32>
    %61 = vector.shape_cast %60 : vector<8x32xf32> to vector<1x8x32xf32>
    %62 = vector.extract_strided_slice %21 {offsets = [0, 64], sizes = [8, 32], strides = [1, 1]} : vector<8x128xf32> to vector<8x32xf32>
    %63 = vector.shape_cast %62 : vector<8x32xf32> to vector<1x8x32xf32>
    "tpu.trace_start"() <{level = 10 : i32, message = "bqd,bkd->bqk"}> : () -> ()
    %cst_29 = arith.constant dense<0.000000e+00> : vector<1x8x8xf32>
    %64 = tpu.matmul %59, %61, %cst_29 {dimension_numbers = #tpu.dot_dimension_numbers<[2], [2], [1], [1], [0, 0, 0, 1, 1, 1], [0], [0]>} : vector<1x8x32xf32>, vector<1x8x32xf32>, vector<1x8x8xf32> -> vector<1x8x8xf32>
    "tpu.trace_stop"() : () -> ()
    %cst_30 = arith.constant dense<0xFF800000> : vector<1x8xf32>
    %65 = vector.multi_reduction <maximumf>, %64, %cst_30 [2] : vector<1x8x8xf32> to vector<1x8xf32>
    %66 = vector.shape_cast %65 : vector<1x8xf32> to vector<1x8x1xf32>
    %67 = vector.broadcast %66 : vector<1x8x1xf32> to vector<1x8x8xf32>
    %68 = arith.subf %64, %67 : vector<1x8x8xf32>
    %69 = math.exp %68 : vector<1x8x8xf32>
    %cst_31 = arith.constant dense<0.000000e+00> : vector<1x8xf32>
    %70 = vector.multi_reduction <add>, %69, %cst_31 [2] : vector<1x8x8xf32> to vector<1x8xf32>
    %71 = vector.shape_cast %70 : vector<1x8xf32> to vector<1x8x1xf32>
    %72 = vector.broadcast %71 : vector<1x8x1xf32> to vector<1x8x8xf32>
    %73 = arith.divf %69, %72 : vector<1x8x8xf32>
    "tpu.trace_start"() <{level = 10 : i32, message = "bqk,bkd->bqd"}> : () -> ()
    %cst_32 = arith.constant dense<0.000000e+00> : vector<1x8x32xf32>
    %74 = tpu.matmul %73, %63, %cst_32 {dimension_numbers = #tpu.dot_dimension_numbers<[2], [1], [1], [2], [0, 0, 0, 1, 1, 2], [0], [0]>} : vector<1x8x8xf32>, vector<1x8x32xf32>, vector<1x8x32xf32> -> vector<1x8x32xf32>
    "tpu.trace_stop"() : () -> ()
    %75 = vector.shape_cast %74 : vector<1x8x32xf32> to vector<8x32xf32>
    %76 = vector.extract_strided_slice %11 {offsets = [0, 96], sizes = [8, 32], strides = [1, 1]} : vector<8x128xf32> to vector<8x32xf32>
    %77 = vector.shape_cast %76 : vector<8x32xf32> to vector<1x8x32xf32>
    %78 = vector.extract_strided_slice %16 {offsets = [0, 96], sizes = [8, 32], strides = [1, 1]} : vector<8x128xf32> to vector<8x32xf32>
    %79 = vector.shape_cast %78 : vector<8x32xf32> to vector<1x8x32xf32>
    %80 = vector.extract_strided_slice %21 {offsets = [0, 96], sizes = [8, 32], strides = [1, 1]} : vector<8x128xf32> to vector<8x32xf32>
    %81 = vector.shape_cast %80 : vector<8x32xf32> to vector<1x8x32xf32>
    "tpu.trace_start"() <{level = 10 : i32, message = "bqd,bkd->bqk"}> : () -> ()
    %cst_33 = arith.constant dense<0.000000e+00> : vector<1x8x8xf32>
    %82 = tpu.matmul %77, %79, %cst_33 {dimension_numbers = #tpu.dot_dimension_numbers<[2], [2], [1], [1], [0, 0, 0, 1, 1, 1], [0], [0]>} : vector<1x8x32xf32>, vector<1x8x32xf32>, vector<1x8x8xf32> -> vector<1x8x8xf32>
    "tpu.trace_stop"() : () -> ()
    %cst_34 = arith.constant dense<0xFF800000> : vector<1x8xf32>
    %83 = vector.multi_reduction <maximumf>, %82, %cst_34 [2] : vector<1x8x8xf32> to vector<1x8xf32>
    %84 = vector.shape_cast %83 : vector<1x8xf32> to vector<1x8x1xf32>
    %85 = vector.broadcast %84 : vector<1x8x1xf32> to vector<1x8x8xf32>
    %86 = arith.subf %82, %85 : vector<1x8x8xf32>
    %87 = math.exp %86 : vector<1x8x8xf32>
    %cst_35 = arith.constant dense<0.000000e+00> : vector<1x8xf32>
    %88 = vector.multi_reduction <add>, %87, %cst_35 [2] : vector<1x8x8xf32> to vector<1x8xf32>
    %89 = vector.shape_cast %88 : vector<1x8xf32> to vector<1x8x1xf32>
    %90 = vector.broadcast %89 : vector<1x8x1xf32> to vector<1x8x8xf32>
    %91 = arith.divf %87, %90 : vector<1x8x8xf32>
    "tpu.trace_start"() <{level = 10 : i32, message = "bqk,bkd->bqd"}> : () -> ()
    %cst_36 = arith.constant dense<0.000000e+00> : vector<1x8x32xf32>
    %92 = tpu.matmul %91, %81, %cst_36 {dimension_numbers = #tpu.dot_dimension_numbers<[2], [1], [1], [2], [0, 0, 0, 1, 1, 2], [0], [0]>} : vector<1x8x8xf32>, vector<1x8x32xf32>, vector<1x8x32xf32> -> vector<1x8x32xf32>
    "tpu.trace_stop"() : () -> ()
    %93 = vector.shape_cast %92 : vector<1x8x32xf32> to vector<8x32xf32>
    %94 = tpu.concatenate %39, %57, %75, %93 in 1 : vector<8x32xf32>, vector<8x32xf32>, vector<8x32xf32>, vector<8x32xf32> -> vector<8x128xf32>
    %c0_37 = arith.constant 0 : index
    %c0_38 = arith.constant 0 : index
    %95 = vector.load %arg11[%c0_37, %c0_38] : memref<128x32xf32, #tpu.memory_space<vmem>>, vector<128x32xf32>
    %cst_39 = arith.constant dense<0.000000e+00> : vector<8x32xf32>
    %96 = tpu.matmul %94, %95, %cst_39 {dimension_numbers = #tpu.dot_dimension_numbers<[1], [0], [0], [1], [0, 0, 1, 1], [], []>} : vector<8x128xf32>, vector<128x32xf32>, vector<8x32xf32> -> vector<8x32xf32>
    %c0_40 = arith.constant 0 : index
    %c0_41 = arith.constant 0 : index
    %97 = vector.load %arg12[%c0_40, %c0_41] : memref<1x32xf32, #tpu.memory_space<vmem>>, vector<1x32xf32>
    %98 = vector.broadcast %97 : vector<1x32xf32> to vector<8x32xf32>
    %99 = arith.addf %96, %98 : vector<8x32xf32>
    %c0_42 = arith.constant 0 : index
    %c0_43 = arith.constant 0 : index
    %100 = vector.load %arg13[%c0_42, %c0_43] : memref<8x32xf32, #tpu.memory_space<vmem>>, vector<8x32xf32>
    tpu.vector_store %arg13[%c0_42, %c0_43], %99 {strides = array<i32>} : memref<8x32xf32, #tpu.memory_space<vmem>>, vector<8x32xf32>,
    return
  }
  func.func @transform_0(%arg0: i32) -> (i32, i32) {
    %c0_i32 = arith.constant 0 : i32
    %c0_i32_0 = arith.constant 0 : i32
    return %arg0, %c0_i32 : i32, i32
  }
  func.func @transform_1(%arg0: i32) -> (i32, i32) {
    %c0_i32 = arith.constant 0 : i32
    %c0_i32_0 = arith.constant 0 : i32
    return %arg0, %c0_i32 : i32, i32
  }
  func.func @transform_2(%arg0: i32) -> (i32, i32) {
    %c0_i32 = arith.constant 0 : i32
    %c0_i32_0 = arith.constant 0 : i32
    return %arg0, %c0_i32 : i32, i32
  }
  func.func @transform_3(%arg0: i32) -> (i32, i32) {
    %c0_i32 = arith.constant 0 : i32
    %c0_i32_0 = arith.constant 0 : i32
    return %arg0, %c0_i32 : i32, i32
  }
  func.func @transform_4(%arg0: i32) -> (i32, i32) {
    %c0_i32 = arith.constant 0 : i32
    %c0_i32_0 = arith.constant 0 : i32
    %c0_i32_1 = arith.constant 0 : i32
    return %c0_i32, %c0_i32_0 : i32, i32
  }
  func.func @transform_5(%arg0: i32) -> (i32, i32) {
    %c0_i32 = arith.constant 0 : i32
    %c0_i32_0 = arith.constant 0 : i32
    %c0_i32_1 = arith.constant 0 : i32
    return %c0_i32, %c0_i32_0 : i32, i32
  }
  func.func @transform_6(%arg0: i32) -> (i32, i32) {
    %c0_i32 = arith.constant 0 : i32
    %c0_i32_0 = arith.constant 0 : i32
    %c0_i32_1 = arith.constant 0 : i32
    return %c0_i32, %c0_i32_0 : i32, i32
  }
  func.func @transform_7(%arg0: i32) -> (i32, i32) {
    %c0_i32 = arith.constant 0 : i32
    %c0_i32_0 = arith.constant 0 : i32
    %c0_i32_1 = arith.constant 0 : i32
    return %c0_i32, %c0_i32_0 : i32, i32
  }
  func.func @transform_8(%arg0: i32) -> (i32, i32) {
    %c0_i32 = arith.constant 0 : i32
    %c0_i32_0 = arith.constant 0 : i32
    %c0_i32_1 = arith.constant 0 : i32
    return %c0_i32, %c0_i32_0 : i32, i32
  }
  func.func @transform_9(%arg0: i32) -> (i32, i32) {
    %c0_i32 = arith.constant 0 : i32
    %c0_i32_0 = arith.constant 0 : i32
    %c0_i32_1 = arith.constant 0 : i32
    return %c0_i32, %c0_i32_0 : i32, i32
  }
  func.func @transform_10(%arg0: i32) -> (i32, i32) {
    %c0_i32 = arith.constant 0 : i32
    %c0_i32_0 = arith.constant 0 : i32
    %c0_i32_1 = arith.constant 0 : i32
    return %c0_i32, %c0_i32_0 : i32, i32
  }
  func.func @transform_11(%arg0: i32) -> (i32, i32) {
    %c0_i32 = arith.constant 0 : i32
    %c0_i32_0 = arith.constant 0 : i32
    %c0_i32_1 = arith.constant 0 : i32
    return %c0_i32, %c0_i32_0 : i32, i32
  }
  func.func @transform_12(%arg0: i32) -> (i32, i32) {
    %c0_i32 = arith.constant 0 : i32
    %c0_i32_0 = arith.constant 0 : i32
    return %arg0, %c0_i32 : i32, i32
  }
}

</mosaic_0001>

<bundles_post_ra>
// kernel: tpu_custom_call.1
= control target key start
LH: loop header
LB: loop body
LE: loop exit
PB: predicated region body
PF: predicated region fallthrough
CT: control target
= control target key end

     0   :  { %s1506_s0 = inlined_call_operand.vmem [shape: f32[16,32], index: 0, kind: input, shape index: {}]   ;;  %s1507_s1 = inlined_call_operand.vmem [shape: f32[16,32], index: 1, kind: input, shape index: {}]   ;;  %s1508_s2 = inlined_call_operand.vmem [shape: f32[16,32], index: 2, kind: input, shape index: {}]   ;;  %s1509_s3 = inlined_call_operand.vmem [shape: f32[16,32], index: 3, kind: input, shape index: {}]   ;;  %s1510_s4 = inlined_call_operand.vmem [shape: f32[32,128], index: 4, kind: input, shape index: {}]   ;;  %s1511_s5 = inlined_call_operand.vmem [shape: f32[1,128], index: 5, kind: input, shape index: {}]   ;;  %s1512_s6 = inlined_call_operand.vmem [shape: f32[32,128], index: 6, kind: input, shape index: {}]   ;;  %s1513_s7 = inlined_call_operand.vmem [shape: f32[1,128], index: 7, kind: input, shape index: {}]   ;;  %s1514_s8 = inlined_call_operand.vmem [shape: f32[32,128], index: 8, kind: input, shape index: {}]   ;;  %s1515_s9 = inlined_call_operand.vmem [shape: f32[1,128], index: 9, kind: input, shape index: {}]   ;;  %s1516_s10 = inlined_call_operand.vmem [shape: f32[128,32], index: 10, kind: input, shape index: {}]   ;;  %s1517_s11 = inlined_call_operand.vmem [shape: f32[1,32], index: 11, kind: input, shape index: {}]   ;;  %s1518_s12 = inlined_call_operand.hbm [shape: f32[16,32], index: 12, kind: output, shape index: {}]  }
   0x1   :  { %1522 = sst [smem:[#allocation8_spill]] %s1512_s6 }
   0x2   :  { %17 = vsyncpa [#allocation3], 0 }
   0x3   :  { %19 = vsyncpa [#allocation3 + $0x1], 0  ;;  %s1261_s21 = smov 0   ;;  %s1263_s22 = smov 0  }
   0x4   :  { %s1265_s23 = smov 0   ;;  %s1267_s24 = smov 0  }
   0x5 LB: > { %1523 = sst [smem:[#allocation5_spill]] %s1187_s23  ;;  %s1282_s25 = sadd.s32 4294967295, %s1191_s24   ;;  %s1191_s24 = sphi %s1267_s24, %s1529_s24   ;;  %s1187_s23 = sphi %s1265_s23, %s1531_s23   ;;  %s1183_s22 = sphi %s1263_s22, %s1533_s22   ;;  %s1179_s21 = sphi %s1261_s21, %s1532_s21  }
   0x6   : > { %s1039_s26 = sadd.s32 4294967294, %s1191_s24   ;;  %s1286_s27 = sadd.s32 1, %s1191_s24  }
   0x7   : > { %1524 = sst [smem:[#allocation6_spill]] %s1286_s27  ;;  %s304_s28 = sadd.s32 1, %s1187_s23 }
   0x8   : > { %s301_s29 = ssub.s32 %s1191_s24, %s1286_s27  ;;  %p314_p0 = scmp.ne.s32.totalorder %s1187_s23, %s1183_s22 }
   0x9   : > { %p302_p1 = scmp.eq.s32.totalorder %s301_s29, 0  ;;  %p315_p2 = scmp.eq.s32.totalorder %s1282_s25, 1 }
   0xa   : > { %p320_p3 = scmp.ne.s32.totalorder %s1183_s22, %s1179_s21  ;;  %p321_p4 = scmp.eq.s32.totalorder %s1039_s26, 1 }
   0xb   : > { %s1297_s30 = scalar_select %p302_p1, %s1187_s23, %s304_s28  }
   0xc   : > { %p1299_p5 = por %p315_p2, %p314_p0  ;;  %p1303_p6 = por %p321_p4, %p320_p3 }
   0xd   : > { %1525 = sst [smem:[#allocation7_spill]] %s1297_s30  ;;  %p1042_p7 = scmp.ge.s32.totalorder %s1191_s24, 1 }
   0xe   : > { %p391_p8 = scmp.lt.s32.totalorder %s1191_s24, 3 }
  0x10   : > { %p392_p9 = pnand %p1042_p7, %p391_p8 }
  0x11   : > { %s1528_s6 = sld [smem:[#allocation8_spill]] (!%p392_p9)  ;;  %p444_p10 = scmp.lt.s32.totalorder (!%p392_p9), %s1282_s25, 1 }
  0x12   : > { %395 = sbr.rel (%p392_p9) target bundleno = 1067 (0x42b), region = 68  ;;  %s1194_s27 = smov (!%p392_p9), 64  }
  0x17   : > { %v502_v0 = vld [vmem:[%s1528_s6 + $0x18] sm:$0xff]  ;;  %v501_v1 = vld [vmem:[%s1528_s6 + $0x10] sm:$0xff]  ;;  %v500_v4 = vld [vmem:[%s1528_s6 + $0x8] sm:$0xff]  ;;  %s445_s17 = scalar_select %p444_p10, %s1282_s25, 1  ;;  %vm475_vm0 = vcmask 261120   ;;  %vm587_vm1 = vcmask 64512  }
  0x18   : > { %v470_v2 = vld [vmem:[%s1510_s4 + $0x18] sm:$0xff]  ;;  %522 = vmatpush.msra.mxu1 %v502_v0  ;;  %v469_v3 = vld [vmem:[%s1510_s4 + $0x10] sm:$0xff]  ;;  %v468_v5 = vld [vmem:[%s1510_s4 + $0x8] sm:$0xff] }
  0x19   : > { %491 = vmatpush.msra.mxu0 %v470_v2  ;;  %v533_v6 = vld [vmem:[%s1514_s8 + $0x18] sm:$0xff]  ;;  %v499_v7 = vld [vmem:[%s1528_s6] sm:$0xff]  ;;  %v532_v8 = vld [vmem:[%s1514_s8 + $0x10] sm:$0xff]  ;;  %s1044_s29 = sshll.u32 %s445_s17, 3  ;;  %s1195_s17 = smov 96  }
  0x1a   : > { %523 = vmatpush.msra.mxu1 %v501_v1  ;;  %v467_v9 = vld [vmem:[%s1510_s4] sm:$0xff]  ;;  %553 = vmatpush.msra.mxu3 %v533_v6  ;;  %v531_v10 = vld [vmem:[%s1514_s8 + $0x8] sm:$0xff]  ;;  %s451_s19 = scalar_lea.vmem %s1507_s1, %s1044_s29  ;;  %s459_s26 = scalar_lea.vmem %s1509_s3, %s1044_s29 }
  0x1b   : > { %492 = vmatpush.msra.mxu0 %v469_v3  ;;  %v460_v11 = vld [vmem:[%s459_s26] sm:$0xff]  ;;  %s447_s28 = scalar_lea.vmem %s1506_s0, %s1044_s29  ;;  %s455_s16 = scalar_lea.vmem %s1508_s2, %s1044_s29 }
  0x1c   : > { %524 = vmatpush.msra.mxu1 %v500_v4  ;;  %v463_v12 = vld [vmem:[%s451_s19] sm:$0xff]  ;;  %554 = vmatpush.msra.mxu3 %v532_v8  ;;  %s1193_s26 = smov 32   ;;  %s441_s19 = sand.u32 1, %s1183_s22  }
  0x1d   : > { %493 = vmatpush.msra.mxu0 %v468_v5  ;;  %v464_v13 = vadd.f32 %v463_v12, %v460_v11  ;;  %v461_v14 = vld [vmem:[%s447_s28] sm:$0xff]  ;;  %s1043_s20 = sshll.u32 %s441_s19, 3  ;;  %s1064_s28 = sshll.u32 %s1282_s25, 3 }
  0x1e   : > { %525 = vmatpush.msra.mxu1 %v499_v7  ;;  %v530_v15 = vld [vmem:[%s1514_s8] sm:$0xff]  ;;  %v462_v17 = vadd.f32 %v461_v14, %v460_v11  ;;  %555 = vmatpush.msra.mxu3 %v531_v10 }
  0x1f   : > { %494 = vmatpush.msra.mxu0 %v467_v9  ;;  %v465_v16 = vld [vmem:[%s455_s16] sm:$0xff]  ;;  %1049 = vmatmul.msk.f32.vlgmr.msra.gmra.mxu1 %vm475_vm0, %v464_v13  ;;  %s939_s16 = scalar_lea.hbm %s1518_s12, %s1064_s28 }
  0x20   : > { %v466_v18 = vadd.f32 %v465_v16, %v460_v11  ;;  %1048 = vmatmul.msk.f32.vlgmr.msra.gmra.mxu0 %vm475_vm0, %v462_v17  ;;  %556 = vmatpush.msra.mxu3 %v530_v15  ;;  %v1109_v19 = vld [vmem:[%s1513_s7] ss:$0 sm:$0xff] }
  0x21   : > { %v1110_v20 = vld [vmem:[%s1511_s5] ss:$0 sm:$0xff] }
  0x22   : > { %1050 = vmatmul.msk.f32.vlgmr.msra.gmra.mxu3 %vm475_vm0, %v466_v18  ;;  %v1111_v25 = vld [vmem:[%s1515_s9] ss:$0 sm:$0xff] }
  0x9c   : > { %v527_v21 = vpop.f32.mrf.mxu1 }
  0x9d   : > { %v528_v22 = vadd.f32 %v1109_v19, %v527_v21  ;;  %v496_v23 = vpop.f32.mrf.mxu0 }
  0x9e   : > { %v497_v24 = vadd.f32 %v1110_v20, %v496_v23 }
  0x9f   : > { %794 = vrot.lane.b32.xlu2 %v528_v22, %s1193_s26  ;;  %716 = vrot.lane.b32.xlu1 %v528_v22, %s1194_s27 }
  0xa0   : > { %637 = vrot.lane.b32.xlu0 %v528_v22, %s1195_s17  ;;  %1051 = vmatpush.xpose.msk.msrb.mxu3 %vm475_vm0, %v528_v22 }
  0xa3   : > { %1052 = vmatmul.msk.f32.vlgmr.msrb.gmra.mxu3 %vm475_vm0, %v497_v24 }
  0xa5   : > { %v558_v26 = vpop.f32.mrf.mxu3 }
  0xa6   : > { %v1379_v27 = vadd.f32 %v1111_v25, %v558_v26 }
  0xa7   : > { %792 = vrot.lane.b32.xlu2 %v497_v24, %s1193_s26  ;;  %714 = vrot.lane.b32.xlu1 %v497_v24, %s1194_s27 }
  0xa8   : > { %635 = vrot.lane.b32.xlu0 %v497_v24, %s1195_s17  ;;  %630 = vmatpush.msra.mxu3 %v1379_v27 }
  0xf9   : > { %v795_v31 = vpop.permute.xlu2 %794 }
 0x101   : > { %v793_v35 = vpop.permute.xlu2 %792 }
 0x111   : > { %v717_v28 = vpop.permute.xlu1 %716 }
 0x112   : > { %v638_v29 = vpop.permute.xlu0 %637 }
 0x113   : > { %1054 = vmatpush.xpose.msk.msrb.mxu0 %vm475_vm0, %v638_v29 }
 0x117   : > { %1057 = vmatpush.xpose.msk.msra.mxu0 %vm475_vm0, %v717_v28 }
 0x119   : > { %v715_v32 = vpop.permute.xlu1 %714 }
 0x11a   : > { %v636_v30 = vpop.permute.xlu0 %635 }
 0x11b   : > { %1055 = vmatmul.msk.f32.vlgmr.msrb.gmra.mxu0 %vm475_vm0, %v636_v30 }
 0x11c   : > { %1060 = vmatpush.xpose.msk.msrb.mxu0 %vm475_vm0, %v795_v31 }
 0x123   : > { %1058 = vmatmul.msk.f32.vlgmr.msra.gmra.mxu0 %vm475_vm0, %v715_v32 }
 0x126   : > { %v584_v33 = vpop.f32.mrf.mxu3 }
 0x127   : > { %v588_v34 = vsel %vm587_vm1, %v584_v33, -inf }
 0x128   : > { %589 = vmax.xlane.f32.xlu0 %v588_v34 }
 0x12b   : > { %1061 = vmatmul.msk.f32.vlgmr.msrb.gmra.mxu0 %vm475_vm0, %v793_v35 }
 0x198   : > { %v660_v36 = vpop.f32.mrf.mxu0 }
 0x199   : > { %v663_v37 = vsel %vm587_vm1, %v660_v36, -inf }
 0x19a   : > { %664 = vmax.xlane.f32.xlu1 %v663_v37 }
 0x19b   : > { %v590_v38 = vpop.xlane.xlu0 %589 }
 0x19c   : > { %v591_v39 = vsub.f32 %v584_v33, %v590_v38 }
 0x19e   : > { %v592_v40 = vmul.f32 1.442695, %v591_v39 }
 0x1a0   : > { %1113 = vpow2.f32 %v592_v40  ;;  %v739_v41 = vpop.f32.mrf.mxu0 }
 0x1a1   : > { %v742_v42 = vsel %vm587_vm1, %v739_v41, -inf }
 0x1a2   : > { %743 = vmax.xlane.f32.xlu2 %v742_v42 }
 0x1a6   : > { %v1114_v43 = vpop.eup %1113 }
 0x1a7   : > { %v594_v44 = vsel %vm587_vm1, %v1114_v43, 0.0 }
 0x1a8   : > { %v817_v45 = vpop.f32.mrf.mxu0  ;;  %595 = vadd.xlane.f32.xlu0 %v594_v44 }
 0x1a9   : > { %v820_v46 = vsel %vm587_vm1, %v817_v45, -inf }
 0x1aa   : > { %821 = vmax.xlane.f32.xlu2 %v820_v46 }
 0x20d   : > { %v665_v47 = vpop.xlane.xlu1 %664 }
 0x20e   : > { %v666_v48 = vsub.f32 %v660_v36, %v665_v47 }
 0x210   : > { %v667_v49 = vmul.f32 1.442695, %v666_v48 }
 0x212   : > { %1115 = vpow2.f32 %v667_v49  ;;  %v902_v49 = vld [vmem:[%s1516_s10 + $0x78] sm:$0xff] }
 0x213   : > { %907 = vmatpush.msra.mxu2 %v902_v49 }
 0x215   : > { %v744_v50 = vpop.xlane.xlu2 %743 }
 0x216   : > { %v745_v51 = vsub.f32 %v739_v41, %v744_v50  ;;  %v901_v50 = vld [vmem:[%s1516_s10 + $0x70] sm:$0xff] }
 0x217   : > { %908 = vmatpush.msra.mxu2 %v901_v50 }
 0x218   : > { %v1393_v52 = vpop.eup %1115  ;;  %v746_v53 = vmul.f32 1.442695, %v745_v51  ;;  %v900_v51 = vld [vmem:[%s1516_s10 + $0x68] sm:$0xff] }
 0x219   : > { %v669_v54 = vsel %vm587_vm1, %v1393_v52, 0.0  ;;  %909 = vmatpush.msra.mxu2 %v900_v51 }
 0x21a   : > { %1117 = vpow2.f32 %v746_v53  ;;  %670 = vadd.xlane.f32.xlu1 %v669_v54 }
 0x21b   : > { %v596_v55 = vpop.xlane.xlu0 %595 }
 0x21c   : > { %1119 = vrcp.f32 %v596_v55  ;;  %v608_v0 = vand.u32 2147483648, %v596_v55  ;;  %v606_v2 = vand.u32 2147483647, %v596_v55  ;;  %vm602_vm3 = vweird.f32 %v596_v55 }
 0x21d   : > { %v822_v56 = vpop.xlane.xlu2 %821 }
 0x21e   : > { %v823_v57 = vsub.f32 %v817_v45, %v822_v56  ;;  %v609_v6 = vor.u32 1.1754944e-38, %v608_v0  ;;  %vm607_vm5 = vcmp.eq.f32.partialorder %v606_v2, 8.507059e+37  ;;  %v891_v0 = vld [vmem:[%s1516_s10 + $0x20] sm:$0xff]  ;;  %v889_v2 = vld [vmem:[%s1516_s10 + $0x10] sm:$0xff] }
 0x220   : > { %v1397_v58 = vpop.eup %1117  ;;  %v824_v59 = vmul.f32 1.442695, %v823_v57  ;;  %v898_v57 = vld [vmem:[%s1516_s10 + $0x58] sm:$0xff] }
 0x221   : > { %v748_v60 = vsel %vm587_vm1, %v1397_v58, 0.0 }
 0x222   : > { %v1120_v61 = vpop.eup %1119  ;;  %1121 = vpow2.f32 %v824_v59  ;;  %749 = vadd.xlane.f32.xlu2 %v748_v60  ;;  %v896_v59 = vld [vmem:[%s1516_s10 + $0x48] sm:$0xff]  ;;  %v895_v60 = vld [vmem:[%s1516_s10 + $0x40] sm:$0xff] }
 0x223   : > { %v598_v62 = vmul.f32 %v1120_v61, %v596_v55  ;;  %vm603_vm2 = vweird.f32 %v1120_v61 }
 0x224   : > { %vm604_vm4 = vmor %vm602_vm3, %vm603_vm2 }
 0x225   : > { %v599_v63 = vsub.f32 1.0, %v598_v62  ;;  %v893_v62 = vld [vmem:[%s1516_s10 + $0x30] sm:$0xff] }
 0x227   : > { %v600_v1 = vmul.f32 %v1120_v61, %v599_v63  ;;  %v892_v63 = vld [vmem:[%s1516_s10 + $0x28] sm:$0xff] }
 0x228   : > { %v1401_v3 = vpop.eup %1121 }
 0x229   : > { %v601_v4 = vadd.f32 %v1120_v61, %v600_v1  ;;  %v826_v5 = vsel %vm587_vm1, %v1401_v3, 0.0  ;;  %v890_v1 = vld [vmem:[%s1516_s10 + $0x18] sm:$0xff] }
 0x22a   : > { %827 = vadd.xlane.f32.xlu0 %v826_v5 }
 0x22b   : > { %v605_v7 = vsel %vm604_vm4, %v1120_v61, %v601_v4  ;;  %v894_v61 = vld [vmem:[%s1516_s10 + $0x38] sm:$0xff]  ;;  %v887_v4 = vld [vmem:[%s1516_s10] sm:$0xff]  ;;  %vm885_vm4 = vcmask 785408  }
 0x22c   : > { %v610_v8 = vsel %vm607_vm5, %v609_v6, %v605_v7 }
 0x22d   : > { %v611_v9 = vmul.f32 %v1114_v43, %v610_v8 }
 0x22f   : > { %1053 = vmatmul.msk.f32.vlgmr.msra.gmra.mxu3 %vm587_vm1, %v611_v9 }
 0x233   : > { %688 = vrot.lane.b32.xlu1 %v1379_v27, %s1195_s17 }
 0x23a   : > { %766 = vrot.lane.b32.xlu2 %v1379_v27, %s1194_s27 }
 0x23e   : > { %844 = vrot.lane.b32.xlu0 %v1379_v27, %s1193_s26 }
 0x28d   : > { %v671_v10 = vpop.xlane.xlu1 %670 }
 0x28e   : > { %1123 = vrcp.f32 %v671_v10  ;;  %v683_v18 = vand.u32 2147483648, %v671_v10  ;;  %vm677_vm7 = vweird.f32 %v671_v10  ;;  %v681_v19 = vand.u32 2147483647, %v671_v10 }
 0x290   : > { %v684_v25 = vor.u32 1.1754944e-38, %v683_v18  ;;  %vm682_vm9 = vcmp.eq.f32.partialorder %v681_v19, 8.507059e+37 }
 0x294   : > { %v1124_v11 = vpop.eup %1123 }
 0x295   : > { %v673_v12 = vmul.f32 %v1124_v11, %v671_v10  ;;  %v750_v13 = vpop.xlane.xlu2 %749  ;;  %vm678_vm6 = vweird.f32 %v1124_v11 }
 0x296   : > { %1125 = vrcp.f32 %v750_v13  ;;  %vm679_vm8 = vmor %vm677_vm7, %vm678_vm6  ;;  %v762_v26 = vand.u32 2147483648, %v750_v13  ;;  %v760_v28 = vand.u32 2147483647, %v750_v13  ;;  %vm756_vm11 = vweird.f32 %v750_v13 }
 0x297   : > { %v674_v14 = vsub.f32 1.0, %v673_v12 }
 0x298   : > { %v763_v32 = vor.u32 1.1754944e-38, %v762_v26  ;;  %vm761_vm13 = vcmp.eq.f32.partialorder %v760_v28, 8.507059e+37 }
 0x299   : > { %v675_v15 = vmul.f32 %v1124_v11, %v674_v14 }
 0x29b   : > { %v676_v16 = vadd.f32 %v1124_v11, %v675_v15 }
 0x29c   : > { %v1126_v17 = vpop.eup %1125 }
 0x29d   : > { %v752_v20 = vmul.f32 %v1126_v17, %v750_v13  ;;  %v767_v21 = vpop.permute.xlu2 %766  ;;  %v828_v22 = vpop.xlane.xlu0 %827  ;;  %v680_v24 = vsel %vm679_vm8, %v1124_v11, %v676_v16  ;;  %vm757_vm10 = vweird.f32 %v1126_v17  ;;  %v1112_v11 = vld [vmem:[%s1517_s11] ss:$0 sm:$0xff] }
 0x29e   : > { %1127 = vrcp.f32 %v828_v22  ;;  %787 = vmatpush.msrb.mxu3 %v767_v21  ;;  %v685_v29 = vsel %vm682_vm9, %v684_v25, %v680_v24  ;;  %vm758_vm12 = vmor %vm756_vm11, %vm757_vm10  ;;  %v840_v40 = vand.u32 2147483648, %v828_v22  ;;  %v838_v42 = vand.u32 2147483647, %v828_v22 }
 0x29f   : > { %v753_v23 = vsub.f32 1.0, %v752_v20  ;;  %v686_v36 = vmul.f32 %v1393_v52, %v685_v29  ;;  %vm834_vm15 = vweird.f32 %v828_v22  ;;  %v899_v52 = vld [vmem:[%s1516_s10 + $0x60] sm:$0xff] }
 0x2a0   : > { %v841_v44 = vor.u32 1.1754944e-38, %v840_v40  ;;  %vm839_vm3 = vcmp.eq.f32.partialorder %v838_v42, 8.507059e+37  ;;  %910 = vmatpush.msra.mxu2 %v899_v52 }
 0x2a1   : > { %v754_v27 = vmul.f32 %v1126_v17, %v753_v23 }
 0x2a2   : > { %911 = vmatpush.msra.mxu2 %v898_v57 }
 0x2a3   : > { %v755_v30 = vadd.f32 %v1126_v17, %v754_v27 }
 0x2a4   : > { %v1128_v31 = vpop.eup %1127 }
 0x2a5   : > { %v759_v33 = vsel %vm758_vm12, %v1126_v17, %v755_v30  ;;  %v830_v34 = vmul.f32 %v1128_v31, %v828_v22  ;;  %v689_v35 = vpop.permute.xlu1 %688  ;;  %vm835_vm14 = vweird.f32 %v1128_v31 }
 0x2a6   : > { %v764_v37 = vsel %vm761_vm13, %v763_v32, %v759_v33  ;;  %709 = vmatpush.msrb.mxu1 %v689_v35  ;;  %vm836_vm2 = vmor %vm834_vm15, %vm835_vm14 }
 0x2a7   : > { %v831_v38 = vsub.f32 1.0, %v830_v34  ;;  %1056 = vmatmul.msk.f32.vlgmr.msrb.gmra.mxu1 %vm587_vm1, %v686_v36  ;;  %v765_v39 = vmul.f32 %v1397_v58, %v764_v37  ;;  %v897_v58 = vld [vmem:[%s1516_s10 + $0x50] sm:$0xff] }
 0x2a8   : > { %912 = vmatpush.msra.mxu2 %v897_v58 }
 0x2a9   : > { %v832_v41 = vmul.f32 %v1128_v31, %v831_v38  ;;  %1059 = vmatmul.msk.f32.vlgmr.msrb.gmra.mxu3 %vm587_vm1, %v765_v39 }
 0x2aa   : > { %913 = vmatpush.msra.mxu2 %v896_v59 }
 0x2ab   : > { %v833_v43 = vadd.f32 %v1128_v31, %v832_v41 }
 0x2ac   : > { %914 = vmatpush.msra.mxu2 %v895_v60 }
 0x2ad   : > { %v837_v45 = vsel %vm836_vm2, %v1128_v31, %v833_v43 }
 0x2ae   : > { %v842_v46 = vsel %vm839_vm3, %v841_v44, %v837_v45  ;;  %915 = vmatpush.msra.mxu2 %v894_v61 }
 0x2af   : > { %v843_v47 = vmul.f32 %v1401_v3, %v842_v46  ;;  %v888_v3 = vld [vmem:[%s1516_s10 + $0x8] sm:$0xff] }
 0x2b0   : > { %v845_v48 = vpop.permute.xlu0 %844  ;;  %916 = vmatpush.msra.mxu2 %v893_v62 }
 0x2b1   : > { %865 = vmatpush.msra.mxu1 %v845_v48 }
 0x2b2   : > { %1062 = vmatmul.msk.f32.vlgmr.msra.gmra.mxu1 %vm587_vm1, %v843_v47  ;;  %v632_v53 = vpop.f32.mrf.mxu3  ;;  %917 = vmatpush.msra.mxu2 %v892_v63  ;;  %vm883_vm1 = vcmask 523264  }
 0x2b4   : > { %918 = vmatpush.msra.mxu2 %v891_v0 }
 0x2b6   : > { %919 = vmatpush.msra.mxu2 %v890_v1 }
 0x2b8   : > { %920 = vmatpush.msra.mxu2 %v889_v2 }
 0x2ba   : > { %921 = vmatpush.msra.mxu2 %v888_v3 }
 0x2bc   : > { %922 = vmatpush.msra.mxu2 %v887_v4 }
 0x324   : > { %v711_v54 = vpop.f32.mrf.mxu1 }
 0x325   : > { %871 = vrot.lane.b32.xlu1 %v711_v54, %s1193_s26  ;;  %s443_s26 = scalar_lea.vmem [#allocation2], %s1043_s20  ;;  %s1149_s20 = scalar_lea.hbm %s1518_s12, 16 }
 0x326   : > { %s941_s6 = sshll.u32 %s443_s26, 4  ;;  %s942_s6 = int_to_ptr.vmem [resolvable:$true] %s941_s6 }
 0x32c   : > { %v789_v55 = vpop.f32.mrf.mxu3 }
 0x32d   : > { %875 = vrot.lane.b32.xlu0 %v789_v55, %s1194_s27  ;;  %s943_s27 = sshll.u32 %s939_s16, 4  ;;  %s944_s27 = int_to_ptr.hbm [resolvable:$true] %s943_s27 }
 0x32e   : > { %s1143_s25 = sshra.s32 %s944_s27, 4  ;;  %s1144_s25 = int_to_ptr.hbm [resolvable:$true] %s1143_s25 }
 0x32f   : > { %v867_v56 = vpop.f32.mrf.mxu1  ;;  %s1145_s29 = scalar_lea.hbm %s1144_s25, 8  ;;  %p1150_p0 = scmp.lt.s32.totalorder %s1144_s25, %s1518_s12 }
 0x330   : > { %879 = vrot.lane.b32.xlu2 %v867_v56, %s1195_s17  ;;  %s929_s17 = scalar_lea.sflag [#allocation3], %s441_s19  ;;  %p1146_p11 = scmp.ne.s32.totalorder %s1144_s25, %s1145_s29 }
 0x331   : > { %p1151_p1 = scmp.lt.s32.totalorder %s1149_s20, %s1145_s29 }
 0x332   : > { %p1147_p12 = pnand %p1146_p11, %p1299_p5 }
 0x333   : > { %p1152_p2 = por %p1151_p1, %p1150_p0 }
 0x334   : > { %p1148_p13 = pneg %p1147_p12 }
 0x336   : > { %p1153_p3 = pnand %p1152_p2, %p1148_p13 }
 0x38a   : > { %v880_v8 = vpop.permute.xlu2 %879 }
 0x397   : > { %v872_v5 = vpop.permute.xlu1 %871 }
 0x398   : > { %v882_v6 = vsel %vm475_vm0, %v632_v53, %v872_v5 }
 0x39f   : > { %v876_v7 = vpop.permute.xlu0 %875 }
 0x3a0   : > { %v884_v9 = vsel %vm883_vm1, %v882_v6, %v876_v7 }
 0x3a1   : > { %v886_v10 = vsel %vm885_vm4, %v884_v9, %v880_v8 }
 0x3a2   : > { %923 = vmatmul.f32.vlgmr.msra.gmra.mxu2 %v886_v10 }
 0x425   : > { %v924_v12 = vpop.f32.mrf.mxu2 }
 0x426   : > { %v925_v13 = vadd.f32 %v1112_v11, %v924_v12 }
 0x428   : > { %927 = vst.msk [vmem:[%s443_s26] sm:$0xff] %vm475_vm0, %v925_v13 }
 0x429   : > { %1156 = shalt.err (!%p1153_p3)
}
 0x42a   : > { %1067 = dma.vmem_to_hbm [thread:$0]  (%p1299_p5), %s942_s6, 128, %s944_s27, %s929_s17  }
 0x42b PF: > { %p1073_p4 = scmp.ge.s32.totalorder %s1191_s24, 2  ;;  %s955_s19 = sand.u32 1, %s1179_s21  }
 0x42c   : > { %s956_s23 = scalar_lea.sflag [#allocation3], %s955_s19 }
 0x42d   : > { %p1070_p7 = pnand %p1073_p4, %p1303_p6 }
 0x42f   : > { %p1071_p8 = pneg %p1070_p7 }
 0x431   : > { %1174 = dma.done.wait (%p1071_p8), %s956_s23, 128  }
 0x432   : > { %1176 = vsyncadd (%p1071_p8), %s956_s23, 4294967168  ;;  %s1529_s24 = sld [smem:[#allocation6_spill]]  ;;  %s1532_s21 = smov %s1183_s22 }
 0x433   : > { %s1530_s18 = sld [smem:[#allocation5_spill]] }
 0x434   : > { %s1531_s23 = sld [smem:[#allocation7_spill]] }
 0x438   : > { %p22_p9 = scmp.ge.s32.totalorder %s1529_s24, 4  }
 0x439   : > { %s1533_s22 = smov %s1530_s18 }
 0x43a   :  { %24 = sbr.rel (!%p22_p9) target bundleno = 5 (0x5), region = 112 }
 0x43f   :  { %962 = vsyncpa [#allocation3], 1 }
 0x440   :  { %964 = vsyncpa [#allocation3 + $0x1], 1 }

</bundles_post_ra>
